<compile_context>
chip_gen: v5e
topology: v5e:2x2
jax: 0.10.0
libtpu: 0.0.40
codegen_flags: <defaults>
</compile_context>

<pallas_src>
import math
import functools

import jax
import jax.numpy as jnp
from jax.experimental import pallas as pl
from jax.experimental.pallas import tpu as pltpu

SQRT_HALF = math.sqrt(0.5)
LANE = 128       # vreg lane width
SUBLANE = 8      # vreg sublane count (f32)
TM_TARGET = 1024  # target rows per grid step


def _round_up(x: int, m: int) -> int:
    return ((x + m - 1) // m) * m


# --------------------------------------------------------------------------- #
# Kernel: fused multi-layer GLU block on one (TM, C) row tile.
# Argument order: x_ref, w_cat_0, w_cat_1, ..., o_ref
#   w_cat_i : bf16 (K_i, 2*out_pad) = [w_a | w_b], zero-padded to lane multiples
# --------------------------------------------------------------------------- #
def _glu_block_kernel(x_ref, *refs, num_layers: int, no_first_residual: bool,
                      out_pad: int):
    o_ref = refs[-1]
    w_refs = refs[:-1]

    h = x_ref[...].astype(jnp.float32)          # (tm, C) true channel width
    for i in range(num_layers):
        w = w_refs[i][...]                      # bf16 (K_i, 2*out_pad)
        # Single fused MXU matmul per layer, bf16 operands, f32 accumulation.
        y = jnp.dot(h.astype(jnp.bfloat16), w,
                    preferred_element_type=jnp.float32)
        a = y[:, :out_pad]                      # 128-aligned slices: free
        b = y[:, out_pad:]
        g = a * jax.nn.sigmoid(b)               # GLU gate in f32 (EUP sigmoid)
        if no_first_residual and i == 0:
            h = g
        else:
            if h.shape[1] < out_pad:            # only possible at layer 0
                h = jnp.concatenate(
                    [h, jnp.zeros((h.shape[0], out_pad - h.shape[1]),
                                  jnp.float32)],
                    axis=-1)
            h = h * jnp.float32(SQRT_HALF) + g
    o_ref[...] = h.astype(o_ref.dtype)


# --------------------------------------------------------------------------- #
# Wrapper: row tiling / pallas_call (no channel padding of x in HBM).
# --------------------------------------------------------------------------- #
def glu_block_forward(
    x: jax.Array,
    padded_weights,           # list of bf16 (K_i, 2*out_pad) fused weights
    *,
    out_channels: int,
    out_pad: int,
    no_first_residual: bool,
) -> jax.Array:
    n, c = x.shape
    num_layers = len(padded_weights)

    # Row tiling: aim for TM_TARGET rows/step, but split into >=2 balanced
    # tiles whenever possible so both v7x TensorCores get work.
    n8 = _round_up(max(n, 1), SUBLANE)
    tm = min(TM_TARGET, _round_up(pl.cdiv(n8, 2), SUBLANE))
    tm = max(tm, SUBLANE)
    n_padded = _round_up(n8, tm)

    # Only row-pad (cheap); channels are passed at their true width.
    x_p = x if n_padded == n else jnp.zeros((n_padded, c), x.dtype).at[:n].set(x)

    kernel = functools.partial(
        _glu_block_kernel,
        num_layers=num_layers,
        no_first_residual=no_first_residual,
        out_pad=out_pad,
    )

    itemsize = x.dtype.itemsize
    w_bytes = sum(int(w.size) * w.dtype.itemsize for w in padded_weights)

    # Advisory cost estimate for XLA scheduling around the custom call.
    flops = sum(2 * n_padded * int(w.shape[0]) * int(w.shape[1])
                for w in padded_weights)
    transcendentals = num_layers * n_padded * out_pad
    bytes_accessed = (n_padded * c * itemsize
                      + n_padded * out_pad * itemsize
                      + w_bytes)

    # VMEM limit from actual buffers: double-buffered x/out tiles + weights
    # + generous allowance for in-kernel temporaries + headroom.
    vmem_bytes = (2 * tm * c * itemsize
                  + 2 * tm * out_pad * itemsize
                  + 2 * w_bytes
                  + 4 * tm * (2 * out_pad) * 4
                  + (4 << 20))
    vmem_limit = int(min(max(vmem_bytes, 32 << 20), 64 << 20))

    grid_spec = pl.GridSpec(
        grid=(n_padded // tm,),
        in_specs=(
            [pl.BlockSpec((tm, c), lambda i: (i, 0))]
            + [pl.BlockSpec(w.shape, lambda i: (0, 0)) for w in padded_weights]
        ),
        out_specs=pl.BlockSpec((tm, out_pad), lambda i: (i, 0)),
    )

    out_p = pl.pallas_call(
        kernel,
        out_shape=jax.ShapeDtypeStruct((n_padded, out_pad), x.dtype),
        grid_spec=grid_spec,
        compiler_params=pltpu.CompilerParams(
            dimension_semantics=("parallel",),   # megacore sharding on v7x
            vmem_limit_bytes=vmem_limit,
        ),
        cost_estimate=pl.CostEstimate(
            flops=flops,
            transcendentals=transcendentals,
            bytes_accessed=bytes_accessed,
        ),
    )(x_p, *padded_weights)

    # Lane-dense padded write in the kernel; slice to true width here.
    return out_p[:n, :out_channels]


# --------------------------------------------------------------------------- #
# Module port
# --------------------------------------------------------------------------- #
class GLUBlockPallas:
    """JAX/Pallas re-implementation of the PyTorch GLUBlock forward."""

    def __init__(
        self,
        in_channels: int,
        out_channels: int,
        num_glu_layers: int = 2,
        no_first_residual: bool = False,
        *,
        key: jax.Array,
    ):
        self.in_channels = in_channels
        self.out_channels = out_channels
        self.no_first_residual = no_first_residual
        self.out_pad = _round_up(out_channels, LANE)
        if not no_first_residual:
            assert in_channels == out_channels, "residual requires in == out channels"

        # Synthetic init mimicking torch.nn.Linear.reset_parameters (bias=False):
        # U(-1/sqrt(fan_in), 1/sqrt(fan_in)); stored pre-transposed as
        # [fan_in, 2*out_channels] so forward is plain x @ w.
        self.weights = []
        keys = jax.random.split(key, num_glu_layers)
        for i in range(num_glu_layers):
            fan_in = in_channels if i == 0 else out_channels
            bound = 1.0 / math.sqrt(fan_in)
            w = jax.random.uniform(
                keys[i], (fan_in, 2 * out_channels),
                dtype=jnp.float32, minval=-bound, maxval=bound)
            self.weights.append(w)

        # Fused [w_a | w_b] per layer, zero-padded to (K_i, 2*out_pad), bf16.
        # Layer 0 keeps its true K (= in_channels); later layers pad rows to
        # out_pad (the padded activation columns are exactly zero, so this is
        # exact).  Zero padding survives the bf16 cast exactly.
        self.padded_weights = []
        for i, w in enumerate(self.weights):
            fan_in = in_channels if i == 0 else out_channels
            rows = in_channels if i == 0 else self.out_pad
            w_cat = jnp.zeros((rows, 2 * self.out_pad), jnp.float32)
            w_cat = w_cat.at[:fan_in, :out_channels].set(w[:, :out_channels])
            w_cat = w_cat.at[:fan_in,
                             self.out_pad:self.out_pad + out_channels].set(
                                 w[:, out_channels:])
            self.padded_weights.append(w_cat.astype(jnp.bfloat16))

    def __call__(self, x: jax.Array) -> jax.Array:
        return glu_block_forward(
            x,
            self.padded_weights,
            out_channels=self.out_channels,
            out_pad=self.out_pad,
            no_first_residual=self.no_first_residual,
        )


def _reference_forward(block: GLUBlockPallas, x: jax.Array) -> jax.Array:
    """Plain-JAX reference of the PyTorch forward, mirroring the bf16 MXU dot."""
    h = x.astype(jnp.float32)
    for i, w in enumerate(block.weights):
        y = jnp.dot(h.astype(jnp.bfloat16), w.astype(jnp.bfloat16),
                    preferred_element_type=jnp.float32)
        c = w.shape[1] // 2
        g = y[:, :c] * jax.nn.sigmoid(y[:, c:])
        if block.no_first_residual and i == 0:
            h = g
        else:
            h = h * SQRT_HALF + g
    return h.astype(x.dtype)


if __name__ == "__main__":
    key = jax.random.PRNGKey(0)
    k_x1, k_p1, k_x2, k_p2, k_x3 = jax.random.split(key, 5)

    # Config 1: default residual path (in == out), 2 GLU layers.
    batch, in_c, out_c = 8, 32, 32
    x1 = jax.random.normal(k_x1, (batch, in_c), dtype=jnp.float32)
    block1 = GLUBlockPallas(in_c, out_c, num_glu_layers=2,
                            no_first_residual=False, key=k_p1)
    out1 = jax.block_until_ready(block1(x1))
    ref1 = _reference_forward(block1, x1)
    assert out1.shape == (batch, out_c)
    assert jnp.allclose(out1, ref1, atol=1e-3, rtol=1e-3), "mismatch (residual cfg)"

    # Config 2: no_first_residual with in != out, 3 GLU layers.
    batch2, in_c2, out_c2 = 8, 48, 32
    x2 = jax.random.normal(k_x2, (batch2, in_c2), dtype=jnp.float32)
    block2 = GLUBlockPallas(in_c2, out_c2, num_glu_layers=3,
                            no_first_residual=True, key=k_p2)
    out2 = jax.block_until_ready(block2(x2))
    ref2 = _reference_forward(block2, x2)
    assert out2.shape == (batch2, out_c2)
    assert jnp.allclose(out2, ref2, atol=1e-3, rtol=1e-3), "mismatch (no-first-res cfg)"

    # Config 3: non-sublane-aligned batch -> row padding + multi-step grid.
    batch3 = 20
    x3 = jax.random.normal(k_x3, (batch3, in_c), dtype=jnp.float32)
    out3 = jax.block_until_ready(block1(x3))
    ref3 = _reference_forward(block1, x3)
    assert out3.shape == (batch3, out_c)
    assert jnp.allclose(out3, ref3, atol=1e-3, rtol=1e-3), "mismatch (multi-tile cfg)"

    print("KERNEL_OK")
</pallas_src>

<mosaic_0001>
module attributes {stable_mosaic.version = 11 : i64} {
  func.func @_glu_block_kernel(%arg0: i32, %arg1: memref<8x32xf32, #tpu.memory_space<vmem>>, %arg2: memref<32x256xbf16, #tpu.memory_space<vmem>>, %arg3: memref<128x256xbf16, #tpu.memory_space<vmem>>, %arg4: memref<8x128xf32, #tpu.memory_space<vmem>>) attributes {dimension_semantics = [#tpu.dimension_semantics<parallel>], iteration_bounds = array<i64: 1>, scalar_prefetch = 0 : i64, scratch_operands = 0 : i64, tpu.core_type = #tpu.core_type<tc>, window_params = [{transform_indices = @transform_0, window_bounds = array<i64: 8, 32>}, {pipeline_mode = #tpu.pipeline_mode<synchronous>, transform_indices = @transform_1, window_bounds = array<i64: 32, 256>}, {pipeline_mode = #tpu.pipeline_mode<synchronous>, transform_indices = @transform_2, window_bounds = array<i64: 128, 256>}, {transform_indices = @transform_3, window_bounds = array<i64: 8, 128>}]} {
    %c0 = arith.constant 0 : index
    %c0_0 = arith.constant 0 : index
    %0 = vector.load %arg1[%c0, %c0_0] : memref<8x32xf32, #tpu.memory_space<vmem>>, vector<8x32xf32>
    %c0_1 = arith.constant 0 : index
    %c0_2 = arith.constant 0 : index
    %1 = vector.load %arg2[%c0_1, %c0_2] : memref<32x256xbf16, #tpu.memory_space<vmem>>, vector<32x256xbf16>
    %2 = arith.truncf %0 : vector<8x32xf32> to vector<8x32xbf16>
    %cst = arith.constant dense<0.000000e+00> : vector<8x256xf32>
    %3 = tpu.matmul %2, %1, %cst {dimension_numbers = #tpu.dot_dimension_numbers<[1], [0], [0], [1], [0, 0, 1, 1], [], []>} : vector<8x32xbf16>, vector<32x256xbf16>, vector<8x256xf32> -> vector<8x256xf32>
    %4 = vector.extract_strided_slice %3 {offsets = [0, 0], sizes = [8, 128], strides = [1, 1]} : vector<8x256xf32> to vector<8x128xf32>
    %5 = vector.extract_strided_slice %3 {offsets = [0, 128], sizes = [8, 128], strides = [1, 1]} : vector<8x256xf32> to vector<8x128xf32>
    %6 = arith.negf %5 : vector<8x128xf32>
    %7 = math.exp %6 : vector<8x128xf32>
    %cst_3 = arith.constant 1.000000e+00 : f32
    %8 = vector.broadcast %cst_3 : f32 to vector<8x128xf32>
    %9 = arith.addf %8, %7 : vector<8x128xf32>
    %10 = arith.divf %8, %9 : vector<8x128xf32>
    %11 = arith.mulf %4, %10 : vector<8x128xf32>
    %cst_4 = arith.constant 0.000000e+00 : f32
    %12 = vector.broadcast %cst_4 : f32 to vector<8x96xf32>
    %13 = tpu.concatenate %0, %12 in 1 : vector<8x32xf32>, vector<8x96xf32> -> vector<8x128xf32>
    %cst_5 = arith.constant 0.707106769 : f32
    %14 = vector.broadcast %cst_5 : f32 to vector<8x128xf32>
    %15 = arith.mulf %13, %14 : vector<8x128xf32>
    %16 = arith.addf %15, %11 : vector<8x128xf32>
    %c0_6 = arith.constant 0 : index
    %c0_7 = arith.constant 0 : index
    %17 = vector.load %arg3[%c0_6, %c0_7] : memref<128x256xbf16, #tpu.memory_space<vmem>>, vector<128x256xbf16>
    %18 = arith.truncf %16 : vector<8x128xf32> to vector<8x128xbf16>
    %cst_8 = arith.constant dense<0.000000e+00> : vector<8x256xf32>
    %19 = tpu.matmul %18, %17, %cst_8 {dimension_numbers = #tpu.dot_dimension_numbers<[1], [0], [0], [1], [0, 0, 1, 1], [], []>} : vector<8x128xbf16>, vector<128x256xbf16>, vector<8x256xf32> -> vector<8x256xf32>
    %20 = vector.extract_strided_slice %19 {offsets = [0, 0], sizes = [8, 128], strides = [1, 1]} : vector<8x256xf32> to vector<8x128xf32>
    %21 = vector.extract_strided_slice %19 {offsets = [0, 128], sizes = [8, 128], strides = [1, 1]} : vector<8x256xf32> to vector<8x128xf32>
    %22 = arith.negf %21 : vector<8x128xf32>
    %23 = math.exp %22 : vector<8x128xf32>
    %cst_9 = arith.constant 1.000000e+00 : f32
    %24 = vector.broadcast %cst_9 : f32 to vector<8x128xf32>
    %25 = arith.addf %24, %23 : vector<8x128xf32>
    %26 = arith.divf %24, %25 : vector<8x128xf32>
    %27 = arith.mulf %20, %26 : vector<8x128xf32>
    %cst_10 = arith.constant 0.707106769 : f32
    %28 = vector.broadcast %cst_10 : f32 to vector<8x128xf32>
    %29 = arith.mulf %16, %28 : vector<8x128xf32>
    %30 = arith.addf %29, %27 : vector<8x128xf32>
    %c0_11 = arith.constant 0 : index
    %c0_12 = arith.constant 0 : index
    %31 = vector.load %arg4[%c0_11, %c0_12] : memref<8x128xf32, #tpu.memory_space<vmem>>, vector<8x128xf32>
    tpu.vector_store %arg4[%c0_11, %c0_12], %30 {strides = array<i32>} : memref<8x128xf32, #tpu.memory_space<vmem>>, vector<8x128xf32>,
    return
  }
  func.func @transform_0(%arg0: i32) -> (i32, i32) {
    %c0_i32 = arith.constant 0 : i32
    %c0_i32_0 = arith.constant 0 : i32
    return %arg0, %c0_i32 : i32, i32
  }
  func.func @transform_1(%arg0: i32) -> (i32, i32) {
    %c0_i32 = arith.constant 0 : i32
    %c0_i32_0 = arith.constant 0 : i32
    %c0_i32_1 = arith.constant 0 : i32
    return %c0_i32, %c0_i32_0 : i32, i32
  }
  func.func @transform_2(%arg0: i32) -> (i32, i32) {
    %c0_i32 = arith.constant 0 : i32
    %c0_i32_0 = arith.constant 0 : i32
    %c0_i32_1 = arith.constant 0 : i32
    return %c0_i32, %c0_i32_0 : i32, i32
  }
  func.func @transform_3(%arg0: i32) -> (i32, i32) {
    %c0_i32 = arith.constant 0 : i32
    %c0_i32_0 = arith.constant 0 : i32
    return %arg0, %c0_i32 : i32, i32
  }
}

</mosaic_0001>

<bundles_post_ra>
// kernel: tpu_custom_call.1
= control target key start
LH: loop header
LB: loop body
LE: loop exit
PB: predicated region body
PF: predicated region fallthrough
CT: control target
= control target key end

     0   :  { %8 = vsyncpa [#allocation3], 0  ;;  %s565_s0 = inlined_call_operand.hbm [shape: f32[8,32], index: 0, kind: input, shape index: {}]   ;;  %s566_s1 = inlined_call_operand.hbm [shape: bf16[32,256], index: 1, kind: input, shape index: {}]   ;;  %s567_s2 = inlined_call_operand.hbm [shape: bf16[128,256], index: 2, kind: input, shape index: {}]   ;;  %s568_s3 = inlined_call_operand.hbm [shape: f32[8,128], index: 3, kind: output, shape index: {}]  }
   0x1   :  { %9 = vsyncpa [#allocation6], 0  ;;  %s26_s14 = sshll.u32 %s566_s1, 4  ;;  %s27_s14 = int_to_ptr.hbm [resolvable:$true] %s26_s14 }
   0x2   :  { %10 = vsyncpa [#allocation4], 0  ;;  %s524_s15 = smov [#allocation5]   ;;  %s16_s19 = sshll.u32 %s565_s0, 4  ;;  %s17_s19 = int_to_ptr.hbm [resolvable:$true] %s16_s19 }
   0x3   :  { %s28_s16 = sshll.u32 %s524_s15, 4  ;;  %s525_s20 = smov 128   ;;  %s29_s16 = int_to_ptr.vmem [resolvable:$true] %s28_s16 }
   0x4   :  { %s526_s21 = smov 8   ;;  %s527_s22 = smov [#allocation2]  }
   0x5   :  { %34 = dma.hbm_to_vmem [thread:$0]  %s27_s14, 512, %s29_s16, [#allocation6], %s525_s20, %s525_s20, %s526_s21  }
   0x6   :  { %s18_s23 = sshll.u32 %s527_s22, 4  ;;  %s39_s26 = sshll.u32 %s567_s2, 4  ;;  %s19_s23 = int_to_ptr.vmem [resolvable:$true] %s18_s23  ;;  %s40_s26 = int_to_ptr.hbm [resolvable:$true] %s39_s26 }
   0x7   :  { %21 = dma.hbm_to_vmem [thread:$0]  %s17_s19, 128, %s19_s23, [#allocation3]  }
   0x8   :  { %s528_s1 = smov [#allocation7]  }
   0x9   :  { %s41_s27 = sshll.u32 %s528_s1, 4  ;;  %s42_s27 = int_to_ptr.vmem [resolvable:$true] %s41_s27 }
   0xa   :  { %47 = dma.hbm_to_vmem [thread:$0]  %s40_s26, 2048, %s42_s27, [#allocation6], %s525_s20, %s525_s20, %s526_s21  }
   0xb   :  { %518 = dma.done.wait [#allocation3], 128  }
   0xc   :  { %519 = vsyncadd [#allocation3], 4294967168 }
   0xd   :  { %520 = dma.done.wait [#allocation6], 2560  }
   0xe   :  { %521 = vsyncadd [#allocation6], 4294964736  ;;  %v390_v0 = vld [vmem:[#allocation5 + $0x14] sm:$0xf]  ;;  %v316_v1 = vld [vmem:[#allocation5 + $0x18] sm:$0xf0] }
   0xf   :  { %v388_v2 = vld [vmem:[#allocation5 + $0x4] sm:$0xf]  ;;  %v319_v3 = vor.u32 %v390_v0, %v316_v1  ;;  %v308_v4 = vld [vmem:[#allocation5 + $0x8] sm:$0xf0]  ;;  %v61_v5 = vld [vmem:[#allocation2] sm:$0xff]  ;;  %vm87_vm0 = vcmask 261120  }
  0x10   :  { %v314_v6 = vld [vmem:[#allocation5 + $0x10] sm:$0xf]  ;;  %v559_v7 = vsel %vm87_vm0, %v61_v5, 0.0  ;;  %v391_v8 = vld [vmem:[#allocation5 + $0x14] sm:$0xf0]  ;;  %v311_v10 = vor.u32 %v388_v2, %v308_v4  ;;  %v66_v14 = vpack.c.bf16 %v61_v5, %v61_v5  ;;  %s529_s0 = smov [#allocation8]  }
  0x11   :  { %v306_v9 = vld [vmem:[#allocation5] sm:$0xf]  ;;  %110 = vmatpush.bf16.msra.mxu1 %v319_v3  ;;  %v315_v11 = vor.u32 %v391_v8, %v314_v6  ;;  %v389_v12 = vld [vmem:[#allocation5 + $0x4] sm:$0xf0]  ;;  %v381_v15 = vld [vmem:[#allocation7 + $0x70] sm:$0xf] }
  0x12   :  { %v307_v13 = vor.u32 %v389_v12, %v306_v9  ;;  %v407_v16 = vld [vmem:[#allocation7 + $0x74] sm:$0xf0]  ;;  %v406_v17 = vld [vmem:[#allocation7 + $0x74] sm:$0xf]  ;;  %v383_v19 = vld [vmem:[#allocation7 + $0x78] sm:$0xf0] }
  0x13   :  { %97 = vmatpush.bf16.msra.mxu0 %v315_v11  ;;  %v382_v18 = vor.u32 %v407_v16, %v381_v15  ;;  %v386_v20 = vor.u32 %v406_v17, %v383_v19  ;;  %v373_v21 = vld [vmem:[#allocation7 + $0x60] sm:$0xf]  ;;  %v405_v22 = vld [vmem:[#allocation7 + $0x64] sm:$0xf0]  ;;  %v404_v23 = vld [vmem:[#allocation7 + $0x64] sm:$0xf] }
  0x14   :  { %v374_v24 = vor.u32 %v405_v22, %v373_v21  ;;  %v375_v25 = vld [vmem:[#allocation7 + $0x68] sm:$0xf0]  ;;  %v365_v27 = vld [vmem:[#allocation7 + $0x50] sm:$0xf]  ;;  %v403_v28 = vld [vmem:[#allocation7 + $0x54] sm:$0xf0] }
  0x15   :  { %111 = vmatpush.bf16.msra.mxu1 %v311_v10  ;;  %237 = vmatpush.bf16.msra.mxu2 %v382_v18  ;;  %v378_v26 = vor.u32 %v404_v23, %v375_v25  ;;  %v402_v29 = vld [vmem:[#allocation7 + $0x54] sm:$0xf]  ;;  %v366_v30 = vor.u32 %v403_v28, %v365_v27  ;;  %v367_v31 = vld [vmem:[#allocation7 + $0x58] sm:$0xf0]  ;;  %v357_v33 = vld [vmem:[#allocation7 + $0x40] sm:$0xf] }
  0x16   :  { %250 = vmatpush.bf16.msra.mxu3 %v386_v20  ;;  %v370_v32 = vor.u32 %v402_v29, %v367_v31  ;;  %v401_v34 = vld [vmem:[#allocation7 + $0x44] sm:$0xf0]  ;;  %v400_v35 = vld [vmem:[#allocation7 + $0x44] sm:$0xf]  ;;  %v359_v37 = vld [vmem:[#allocation7 + $0x48] sm:$0xf0] }
  0x17   :  { %98 = vmatpush.bf16.msra.mxu0 %v307_v13  ;;  %v358_v36 = vor.u32 %v401_v34, %v357_v33  ;;  %v362_v38 = vor.u32 %v400_v35, %v359_v37  ;;  %v349_v39 = vld [vmem:[#allocation7 + $0x30] sm:$0xf]  ;;  %v399_v40 = vld [vmem:[#allocation7 + $0x34] sm:$0xf0]  ;;  %v398_v41 = vld [vmem:[#allocation7 + $0x34] sm:$0xf] }
  0x18   :  { %321 = vmatmul.msk.bf16.vlgmr.msra.gmra.mxu1 %vm87_vm0, %v66_v14  ;;  %v350_v42 = vor.u32 %v399_v40, %v349_v39  ;;  %v351_v43 = vld [vmem:[#allocation7 + $0x38] sm:$0xf0]  ;;  %v341_v45 = vld [vmem:[#allocation7 + $0x20] sm:$0xf]  ;;  %v397_v46 = vld [vmem:[#allocation7 + $0x24] sm:$0xf0] }
  0x19   :  { %238 = vmatpush.bf16.msra.mxu2 %v374_v24  ;;  %v354_v44 = vor.u32 %v398_v41, %v351_v43  ;;  %v396_v47 = vld [vmem:[#allocation7 + $0x24] sm:$0xf]  ;;  %v342_v48 = vor.u32 %v397_v46, %v341_v45  ;;  %v343_v49 = vld [vmem:[#allocation7 + $0x28] sm:$0xf0]  ;;  %v333_v51 = vld [vmem:[#allocation7 + $0x10] sm:$0xf] }
  0x1a   :  { %320 = vmatmul.msk.bf16.vlgmr.msra.gmra.mxu0 %vm87_vm0, %v66_v14  ;;  %251 = vmatpush.bf16.msra.mxu3 %v378_v26  ;;  %v346_v50 = vor.u32 %v396_v47, %v343_v49  ;;  %v395_v52 = vld [vmem:[#allocation7 + $0x14] sm:$0xf0]  ;;  %v394_v53 = vld [vmem:[#allocation7 + $0x14] sm:$0xf]  ;;  %v335_v55 = vld [vmem:[#allocation7 + $0x18] sm:$0xf0] }
  0x1b   :  { %v334_v54 = vor.u32 %v395_v52, %v333_v51  ;;  %v338_v56 = vor.u32 %v394_v53, %v335_v55  ;;  %v325_v57 = vld [vmem:[#allocation7] sm:$0xf]  ;;  %v393_v58 = vld [vmem:[#allocation7 + $0x4] sm:$0xf0]  ;;  %v392_v59 = vld [vmem:[#allocation7 + $0x4] sm:$0xf] }
  0x1c   :  { %v326_v60 = vor.u32 %v393_v58, %v325_v57  ;;  %v327_v61 = vld [vmem:[#allocation7 + $0x8] sm:$0xf0]  ;;  %v138_v15 = vmul.f32 0.70710677, %v559_v7  ;;  %s291_s2 = sshll.u32 %s529_s0, 4  ;;  %s293_s30 = sshll.u32 %s568_s3, 4  ;;  %s292_s2 = int_to_ptr.vmem [resolvable:$true] %s291_s2  ;;  %s294_s30 = int_to_ptr.hbm [resolvable:$true] %s293_s30 }
  0x1d   :  { %239 = vmatpush.bf16.msra.mxu2 %v366_v30  ;;  %v330_v62 = vor.u32 %v392_v59, %v327_v61 }
  0x1e   :  { %252 = vmatpush.bf16.msra.mxu3 %v370_v32 }
  0x21   :  { %240 = vmatpush.bf16.msra.mxu2 %v358_v36 }
  0x22   :  { %253 = vmatpush.bf16.msra.mxu3 %v362_v38 }
  0x25   :  { %241 = vmatpush.bf16.msra.mxu2 %v350_v42 }
  0x26   :  { %254 = vmatpush.bf16.msra.mxu3 %v354_v44 }
  0x29   :  { %242 = vmatpush.bf16.msra.mxu2 %v342_v48 }
  0x2a   :  { %255 = vmatpush.bf16.msra.mxu3 %v346_v50 }
  0x2d   :  { %243 = vmatpush.bf16.msra.mxu2 %v334_v54 }
  0x2e   :  { %256 = vmatpush.bf16.msra.mxu3 %v338_v56 }
  0x31   :  { %244 = vmatpush.bf16.msra.mxu2 %v326_v60 }
  0x32   :  { %257 = vmatpush.bf16.msra.mxu3 %v330_v62 }
  0x95   :  { %v113_v63 = vpop.f32.mrf.mxu1 }
  0x96   :  { %v322_v0 = vmul.f32 -1.442695, %v113_v63 }
  0x97   :  { %v100_v1 = vpop.f32.mrf.mxu0 }
  0x98   :  { %414 = vpow2.f32 %v322_v0 }
  0x9d   :  { %v115_v2 = vpop.f32.mrf.mxu1 }
  0x9e   :  { %v415_v3 = vpop.eup %414 }
  0x9f   :  { %v120_v4 = vadd.f32 1.0, %v415_v3  ;;  %v102_v5 = vpop.f32.mrf.mxu0 }
  0xa1   :  { %416 = vrcp.f32 %v120_v4  ;;  %v132_v10 = vand.u32 2147483648, %v120_v4  ;;  %v130_v12 = vand.u32 2147483647, %v120_v4  ;;  %vm126_vm2 = vweird.f32 %v120_v4 }
  0xa3   :  { %v133_v14 = vor.u32 1.1754944e-38, %v132_v10  ;;  %vm131_vm4 = vcmp.eq.f32.partialorder %v130_v12, 8.507059e+37 }
  0xa7   :  { %v417_v6 = vpop.eup %416 }
  0xa8   :  { %v122_v8 = vmul.f32 %v417_v6, %v120_v4  ;;  %vm127_vm1 = vweird.f32 %v417_v6 }
  0xa9   :  { %vm128_vm3 = vmor %vm126_vm2, %vm127_vm1 }
  0xaa   :  { %v123_v9 = vsub.f32 1.0, %v122_v8 }
  0xac   :  { %v124_v11 = vmul.f32 %v417_v6, %v123_v9 }
  0xae   :  { %v125_v13 = vadd.f32 %v417_v6, %v124_v11 }
  0xb0   :  { %v129_v16 = vsel %vm128_vm3, %v417_v6, %v125_v13 }
  0xb1   :  { %v134_v17 = vsel %vm131_vm4, %v133_v14, %v129_v16 }
  0xb2   :  { %v136_v18 = vmul.f32 %v134_v17, %v100_v1 }
  0xb4   :  { %v139_v19 = vadd.f32 %v138_v15, %v136_v18 }
  0xb6   :  { %v156_v20 = vpack.c.bf16 %v139_v19, %v139_v19  ;;  %v283_v37 = vmul.f32 0.70710677, %v139_v19 }
  0xb8   :  { %245 = vmatmul.bf16.vlgmr.msra.gmra.mxu2 %v156_v20  ;;  %258 = vmatmul.bf16.vlgmr.msra.gmra.mxu3 %v156_v20 }
 0x13b   :  { %v246_v21 = vpop.f32.mrf.mxu2  ;;  %v259_v22 = vpop.f32.mrf.mxu3 }
 0x13c   :  { %v387_v23 = vmul.f32 -1.442695, %v259_v22 }
 0x13e   :  { %418 = vpow2.f32 %v387_v23 }
 0x143   :  { %v248_v24 = vpop.f32.mrf.mxu2  ;;  %v261_v25 = vpop.f32.mrf.mxu3 }
 0x144   :  { %v419_v26 = vpop.eup %418 }
 0x145   :  { %v266_v27 = vadd.f32 1.0, %v419_v26 }
 0x147   :  { %420 = vrcp.f32 %v266_v27  ;;  %v278_v30 = vand.u32 2147483648, %v266_v27  ;;  %v276_v32 = vand.u32 2147483647, %v266_v27  ;;  %vm272_vm6 = vweird.f32 %v266_v27 }
 0x149   :  { %v279_v34 = vor.u32 1.1754944e-38, %v278_v30  ;;  %vm277_vm8 = vcmp.eq.f32.partialorder %v276_v32, 8.507059e+37 }
 0x14d   :  { %v421_v28 = vpop.eup %420 }
 0x14e   :  { %v268_v29 = vmul.f32 %v421_v28, %v266_v27  ;;  %vm273_vm5 = vweird.f32 %v421_v28 }
 0x14f   :  { %vm274_vm7 = vmor %vm272_vm6, %vm273_vm5 }
 0x150   :  { %v269_v7 = vsub.f32 1.0, %v268_v29 }
 0x152   :  { %v270_v31 = vmul.f32 %v421_v28, %v269_v7 }
 0x154   :  { %v271_v33 = vadd.f32 %v421_v28, %v270_v31 }
 0x156   :  { %v275_v35 = vsel %vm274_vm7, %v421_v28, %v271_v33 }
 0x157   :  { %v280_v36 = vsel %vm277_vm8, %v279_v34, %v275_v35 }
 0x158   :  { %v282_v38 = vmul.f32 %v280_v36, %v246_v21 }
 0x15a   :  { %v284_v39 = vadd.f32 %v283_v37, %v282_v38 }
 0x15c   :  { %285 = vst [vmem:[#allocation8] sm:$0xff] %v284_v39 }
 0x15d   :  { %296 = dma.vmem_to_hbm [thread:$0]  %s292_s2, 128, %s294_s30, [#allocation4]  }
 0x15e   :  { %522 = dma.done.wait [#allocation4], 128  }
 0x15f   :  { %523 = vsyncadd [#allocation4], 4294967168 }
 0x160   :  { %301 = vsyncpa [#allocation3], 1 }
 0x161   :  { %302 = vsyncpa [#allocation6], 1 }
 0x162   :  { %303 = vsyncpa [#allocation4], 1 }

</bundles_post_ra>
